<compile_context>
chip_gen: v6e
topology: v6e:2x2x1
jax: 0.10.0
libtpu: 0.0.40
codegen_flags: <defaults>
</compile_context>

<pallas_src>
import jax
import jax.numpy as jnp
from jax.experimental import pallas as pl
from jax.experimental.pallas import tpu as pltpu


def _qlinear_kernel(x_ref, w_ref, scale_ref, bias_ref, o_ref, acc_ref):
    """Grid point: M-tile i (axis 0), N-tile j (axis 1), K-tile k (axis 2)."""
    k = pl.program_id(2)

    @pl.when(k == 0)
    def _():
        acc_ref[...] = jnp.zeros_like(acc_ref)

    # int8 -> bf16 cast is exact for all int8 values; MXU bf16 x bf16 -> f32.
    acc_ref[...] += jnp.dot(
        x_ref[...],                              # (tm, tk) bf16
        w_ref[...].astype(jnp.bfloat16),         # (tk, tn) bf16 (from int8)
        preferred_element_type=jnp.float32,
    )

    @pl.when(k == pl.num_programs(2) - 1)
    def _():
        # Scale factored out of the K-sum; applied once, lane-aligned (1, tn).
        scale = scale_ref[...]                   # (1, tn) f32
        bias = bias_ref[...]                     # (1, tn) f32
        o_ref[...] = (acc_ref[...] * scale + bias).astype(o_ref.dtype)


def quantized_linear_int8(x, weight_int8, weight_scale, bias,
                          *, tm=256, tn=256, tk=256):
    """x: [..., K] fp32, weight_int8: [N, K] int8, weight_scale: [N] fp16,
    bias: [N] fp32 -> [..., N] fp32."""
    *lead, K = x.shape
    N, K_w = weight_int8.shape
    assert K == K_w, f"in_features mismatch: x has {K}, weight has {K_w}"

    M = 1
    for d in lead:
        M *= d

    # Tile-size adaptation: avoid silent truncation on non-divisible shapes
    # (fall back to full-extent blocks, which are always legal).
    if tm >= M or M % tm != 0:
        tm = M
    if N % tn != 0:
        tn = N
    if K % tk != 0:
        tk = K
    # TODO(synk): very large non-tile-divisible N/K fall back to full-extent
    # blocks; add masked tail tiles if such shapes show up in practice.

    # One-time (static) layout / dtype prep outside the kernel:
    x2d = x.reshape(M, K).astype(jnp.bfloat16)        # bf16 activations
    w_t = jnp.transpose(weight_int8)                  # [K, N] int8, contracted dim last
    scale2d = weight_scale.astype(jnp.float32).reshape(1, N)
    bias2d = bias.astype(jnp.float32).reshape(1, N)

    grid = (M // tm, N // tn, K // tk)

    out2d = pl.pallas_call(
        _qlinear_kernel,
        out_shape=jax.ShapeDtypeStruct((M, N), jnp.float32),
        grid_spec=pltpu.PrefetchScalarGridSpec(
            num_scalar_prefetch=0,
            grid=grid,
            in_specs=[
                pl.BlockSpec((tm, tk), lambda i, j, k: (i, k)),   # x (bf16)
                pl.BlockSpec((tk, tn), lambda i, j, k: (k, j)),   # weight [K,N] int8
                pl.BlockSpec((1, tn), lambda i, j, k: (0, j)),    # per-out-col scale
                pl.BlockSpec((1, tn), lambda i, j, k: (0, j)),    # bias
            ],
            out_specs=pl.BlockSpec((tm, tn), lambda i, j, k: (i, j)),
            scratch_shapes=[pltpu.VMEM((tm, tn), jnp.float32)],
        ),
        compiler_params=pltpu.CompilerParams(
            dimension_semantics=("parallel", "parallel", "arbitrary"),
            vmem_limit_bytes=32 * 1024 * 1024,
        ),
    )(x2d, w_t, scale2d, bias2d)

    return out2d.reshape(*lead, N)


def make_quantized_params(key, out_features, in_features):
    """Deterministically build int8 weight / fp16 scale / fp32 bias, exactly
    mirroring QuantizedLinearInt8.__init__ applied to a float Linear layer."""
    kw, kb = jax.random.split(key)
    w_fp = jax.random.normal(kw, (out_features, in_features), jnp.float32) * 0.05
    bias = jax.random.normal(kb, (out_features,), jnp.float32) * 0.01

    weight_scale = (jnp.max(jnp.abs(w_fp), axis=-1) / 127.0).astype(jnp.float16)
    # Clamp to avoid divide-by-zero if an output row is all zeros.
    safe_scale = jnp.maximum(weight_scale.astype(jnp.float32), 1e-8)
    weight_int8 = jnp.round(w_fp / safe_scale[:, None]).astype(jnp.int8)
    return weight_int8, weight_scale, bias


if __name__ == "__main__":
    key = jax.random.PRNGKey(0)
    k_x, k_p = jax.random.split(key)

    batch, seq = 2, 8
    in_features, out_features = 256, 256

    x = jax.random.normal(k_x, (batch, seq, in_features), jnp.float32)
    weight_int8, weight_scale, bias = make_quantized_params(
        k_p, out_features, in_features)

    y = quantized_linear_int8(x, weight_int8, weight_scale, bias)
    y = jax.block_until_ready(y)
    assert y.shape == (batch, seq, out_features)

    # Pure-JAX reference (same dequant-then-linear semantics).
    w_deq = (weight_int8.astype(jnp.float32)
             * weight_scale.astype(jnp.float32)[:, None])
    y_ref_f32 = jnp.einsum("bsk,nk->bsn", x, w_deq) + bias[None, None, :]
    # Precision-matched reference (kernel feeds bf16 activations to the MXU).
    x_bf16 = x.astype(jnp.bfloat16).astype(jnp.float32)
    y_ref_bf16 = jnp.einsum("bsk,nk->bsn", x_bf16, w_deq) + bias[None, None, :]

    assert jnp.allclose(y, y_ref_bf16, atol=1e-3, rtol=1e-3)
    assert jnp.allclose(y, y_ref_f32, atol=2e-2, rtol=2e-2)

    print("KERNEL_OK")
</pallas_src>

<mosaic_0001>
module attributes {stable_mosaic.version = 11 : i64} {
  func.func @_qlinear_kernel(%arg0: i32, %arg1: i32, %arg2: i32, %arg3: memref<16x256xbf16, #tpu.memory_space<vmem>>, %arg4: memref<256x256xi8, #tpu.memory_space<vmem>>, %arg5: memref<1x256xf32, #tpu.memory_space<vmem>>, %arg6: memref<1x256xf32, #tpu.memory_space<vmem>>, %arg7: memref<16x256xf32, #tpu.memory_space<vmem>>, %arg8: memref<16x256xf32, #tpu.memory_space<vmem>>) attributes {dimension_semantics = [#tpu.dimension_semantics<parallel>, #tpu.dimension_semantics<parallel>, #tpu.dimension_semantics<arbitrary>], iteration_bounds = array<i64: 1, 1, 1>, scalar_prefetch = 0 : i64, scratch_operands = 1 : i64, tpu.core_type = #tpu.core_type<tc>, window_params = [{transform_indices = @transform_0, window_bounds = array<i64: 16, 256>}, {transform_indices = @transform_1, window_bounds = array<i64: 256, 256>}, {transform_indices = @transform_2, window_bounds = array<i64: 1, 256>}, {transform_indices = @transform_3, window_bounds = array<i64: 1, 256>}, {transform_indices = @transform_4, window_bounds = array<i64: 16, 256>}]} {
    %c0_i32 = arith.constant 0 : i32
    %0 = arith.cmpi eq, %arg2, %c0_i32 : i32
    %1 = arith.extui %0 : i1 to i32
    %c0_i32_0 = arith.constant 0 : i32
    %2 = arith.cmpi ne, %1, %c0_i32_0 : i32
    scf.if %2 {
      %cst_10 = arith.constant 0.000000e+00 : f32
      %13 = vector.broadcast %cst_10 : f32 to vector<16x256xf32>
      %c0_11 = arith.constant 0 : index
      %c0_12 = arith.constant 0 : index
      %14 = vector.load %arg8[%c0_11, %c0_12] : memref<16x256xf32, #tpu.memory_space<vmem>>, vector<16x256xf32>
      tpu.vector_store %arg8[%c0_11, %c0_12], %13 {strides = array<i32>} : memref<16x256xf32, #tpu.memory_space<vmem>>, vector<16x256xf32>,
    } else {
    }
    %c0 = arith.constant 0 : index
    %c0_1 = arith.constant 0 : index
    %3 = vector.load %arg8[%c0, %c0_1] : memref<16x256xf32, #tpu.memory_space<vmem>>, vector<16x256xf32>
    %c0_2 = arith.constant 0 : index
    %c0_3 = arith.constant 0 : index
    %4 = vector.load %arg3[%c0_2, %c0_3] : memref<16x256xbf16, #tpu.memory_space<vmem>>, vector<16x256xbf16>
    %c0_4 = arith.constant 0 : index
    %c0_5 = arith.constant 0 : index
    %5 = vector.load %arg4[%c0_4, %c0_5] : memref<256x256xi8, #tpu.memory_space<vmem>>, vector<256x256xi8>
    %6 = arith.sitofp %5 : vector<256x256xi8> to vector<256x256xbf16>
    %cst = arith.constant dense<0.000000e+00> : vector<16x256xf32>
    %7 = tpu.matmul %4, %6, %cst {dimension_numbers = #tpu.dot_dimension_numbers<[1], [0], [0], [1], [0, 0, 1, 1], [], []>} : vector<16x256xbf16>, vector<256x256xbf16>, vector<16x256xf32> -> vector<16x256xf32>
    %8 = arith.addf %3, %7 : vector<16x256xf32>
    %c0_6 = arith.constant 0 : index
    %c0_7 = arith.constant 0 : index
    %9 = vector.load %arg8[%c0_6, %c0_7] : memref<16x256xf32, #tpu.memory_space<vmem>>, vector<16x256xf32>
    tpu.vector_store %arg8[%c0_6, %c0_7], %8 {strides = array<i32>} : memref<16x256xf32, #tpu.memory_space<vmem>>, vector<16x256xf32>,
    %c0_i32_8 = arith.constant 0 : i32
    %10 = arith.cmpi eq, %arg2, %c0_i32_8 : i32
    %11 = arith.extui %10 : i1 to i32
    %c0_i32_9 = arith.constant 0 : i32
    %12 = arith.cmpi ne, %11, %c0_i32_9 : i32
    scf.if %12 {
      %c0_10 = arith.constant 0 : index
      %c0_11 = arith.constant 0 : index
      %13 = vector.load %arg5[%c0_10, %c0_11] : memref<1x256xf32, #tpu.memory_space<vmem>>, vector<1x256xf32>
      %c0_12 = arith.constant 0 : index
      %c0_13 = arith.constant 0 : index
      %14 = vector.load %arg6[%c0_12, %c0_13] : memref<1x256xf32, #tpu.memory_space<vmem>>, vector<1x256xf32>
      %c0_14 = arith.constant 0 : index
      %c0_15 = arith.constant 0 : index
      %15 = vector.load %arg8[%c0_14, %c0_15] : memref<16x256xf32, #tpu.memory_space<vmem>>, vector<16x256xf32>
      %16 = vector.broadcast %13 : vector<1x256xf32> to vector<16x256xf32>
      %17 = arith.mulf %15, %16 : vector<16x256xf32>
      %18 = vector.broadcast %14 : vector<1x256xf32> to vector<16x256xf32>
      %19 = arith.addf %17, %18 : vector<16x256xf32>
      %c0_16 = arith.constant 0 : index
      %c0_17 = arith.constant 0 : index
      %20 = vector.load %arg7[%c0_16, %c0_17] : memref<16x256xf32, #tpu.memory_space<vmem>>, vector<16x256xf32>
      tpu.vector_store %arg7[%c0_16, %c0_17], %19 {strides = array<i32>} : memref<16x256xf32, #tpu.memory_space<vmem>>, vector<16x256xf32>,
    } else {
    }
    return
  }
  func.func @transform_0(%arg0: i32, %arg1: i32, %arg2: i32) -> (i32, i32) {
    %c0_i32 = arith.constant 0 : i32
    return %arg0, %arg2 : i32, i32
  }
  func.func @transform_1(%arg0: i32, %arg1: i32, %arg2: i32) -> (i32, i32) {
    %c0_i32 = arith.constant 0 : i32
    return %arg2, %arg1 : i32, i32
  }
  func.func @transform_2(%arg0: i32, %arg1: i32, %arg2: i32) -> (i32, i32) {
    %c0_i32 = arith.constant 0 : i32
    %c0_i32_0 = arith.constant 0 : i32
    return %c0_i32, %arg1 : i32, i32
  }
  func.func @transform_3(%arg0: i32, %arg1: i32, %arg2: i32) -> (i32, i32) {
    %c0_i32 = arith.constant 0 : i32
    %c0_i32_0 = arith.constant 0 : i32
    return %c0_i32, %arg1 : i32, i32
  }
  func.func @transform_4(%arg0: i32, %arg1: i32, %arg2: i32) -> (i32, i32) {
    %c0_i32 = arith.constant 0 : i32
    return %arg0, %arg1 : i32, i32
  }
}

</mosaic_0001>

<bundles_post_ra>
// kernel: tpu_custom_call.1
= control target key start
LH: loop header
LB: loop body
LE: loop exit
PB: predicated region body
PF: predicated region fallthrough
CT: control target
= control target key end

     0   :  { %9 = vsyncpa [#allocation4], 0  ;;  %s361_s0 = inlined_call_operand.hbm [shape: bf16[16,256], index: 0, kind: input, shape index: {}]   ;;  %s362_s1 = inlined_call_operand.hbm [shape: s8[256,256], index: 1, kind: input, shape index: {}]   ;;  %s363_s2 = inlined_call_operand.vmem [shape: f32[1,256], index: 2, kind: input, shape index: {}]   ;;  %s364_s3 = inlined_call_operand.vmem [shape: f32[1,256], index: 3, kind: input, shape index: {}]   ;;  %s365_s4 = inlined_call_operand.hbm [shape: f32[16,256], index: 4, kind: output, shape index: {}]  }
   0x1   :  { %10 = vsyncpa [#allocation7], 0 }
   0x2   :  { %11 = vsyncpa [#allocation5], 0  ;;  %s308_s15 = smov [#allocation3]  }
   0x3   :  { %s17_s16 = sshll.u32 %s308_s15, 4  ;;  %s18_s16 = int_to_ptr.vmem [resolvable:$true] %s17_s16 }
   0x4   :  { %s250_s17 = scalar_lea.vmem %s18_s16, 256  ;;  %p255_p1 = scmp.lt.s32.totalorder %s18_s16, %s18_s16 }
   0x5   :  { %p251_p0 = scmp.ne.s32.totalorder %s18_s16, %s250_s17  ;;  %p256_p2 = scmp.lt.s32.totalorder %s250_s17, %s250_s17 }
   0x7   :  { %p257_p3 = por %p256_p2, %p255_p1 }
   0x9   :  { %p258_p4 = pnand %p257_p3, %p251_p0 }
   0xb   :  { %261 = shalt.err (!%p258_p4)
}
   0xc   :  { %s309_s18 = smov 128   ;;  %s310_s19 = smov 8  }
   0xd   :  { %23 = dma.hbm_to_vmem [thread:$0]  %s361_s0, 256, %s18_s16, [#allocation4], %s309_s18, %s309_s18, %s310_s19  }
   0xe   :  { %s311_s22 = smov [#allocation6]  }
   0xf   :  { %s29_s23 = sshll.u32 %s311_s22, 4  ;;  %s30_s23 = int_to_ptr.vmem [resolvable:$true] %s29_s23 }
  0x10   :  { %s270_s24 = scalar_lea.vmem %s30_s23, 2048  ;;  %p275_p6 = scmp.lt.s32.totalorder %s30_s23, %s30_s23 }
  0x11   :  { %p271_p5 = scmp.ne.s32.totalorder %s30_s23, %s270_s24  ;;  %p276_p7 = scmp.lt.s32.totalorder %s270_s24, %s270_s24 }
  0x13   :  { %p277_p8 = por %p276_p7, %p275_p6 }
  0x15   :  { %p278_p9 = pnand %p277_p8, %p271_p5 }
  0x17   :  { %281 = shalt.err (!%p278_p9)
}
  0x18   :  { %s312_s25 = smov 256   ;;  %s313_s26 = smov 16  }
  0x19   :  { %35 = dma.hbm_to_vmem [thread:$0]  %s362_s1, 2048, %s30_s23, [#allocation7], %s312_s25, %s312_s25, %s313_s26  }
  0x1a   :  { %302 = dma.done.wait [#allocation4], 256  }
  0x1b   :  { %303 = vsyncadd [#allocation4], 4294967040 }
  0x1c   :  { %304 = dma.done.wait [#allocation7], 2048  }
  0x1d   :  { %305 = vsyncadd [#allocation7], 4294965248  ;;  %v67_v0 = vld [vmem:[#allocation6 + $0x38] sm:$0xff]  ;;  %v66_v1 = vld [vmem:[#allocation6 + $0x30] sm:$0xff]  ;;  %v179_v50 = vlaneseq }
  0x1e   :  { %v89_v2 = vunpack.c.l.s8.bf16 %v67_v0  ;;  %v91_v3 = vunpack.c.h.s8.bf16 %v67_v0  ;;  %v90_v4 = vunpack.c.h.s8.bf16 %v66_v1  ;;  %v65_v5 = vld [vmem:[#allocation6 + $0x28] sm:$0xff]  ;;  %v88_v6 = vunpack.c.l.s8.bf16 %v66_v1  ;;  %v64_v8 = vld [vmem:[#allocation6 + $0x20] sm:$0xff]  ;;  %v241_v9 = vld [vmem:[#allocation3 + $0x4] ss:$8 sps:$4 sm:$0xff]  }
  0x1f   :  { %v87_v7 = vunpack.c.h.s8.bf16 %v65_v5  ;;  %v86_v10 = vunpack.c.h.s8.bf16 %v64_v8  ;;  %150 = vmatprep.mubr.bf16.mxu0 %v241_v9  ;;  %v85_v11 = vunpack.c.l.s8.bf16 %v65_v5  ;;  %v63_v12 = vld [vmem:[#allocation6 + $0x18] sm:$0xff]  ;;  %v84_v13 = vunpack.c.l.s8.bf16 %v64_v8  ;;  %v62_v15 = vld [vmem:[#allocation6 + $0x10] sm:$0xff]  ;;  %v61_v18 = vld [vmem:[#allocation6 + $0x8] sm:$0xff] }
  0x20   :  { %118 = vmatprep.subr.bf16.mxu0 %v91_v3  ;;  %v83_v14 = vunpack.c.h.s8.bf16 %v63_v12  ;;  %v82_v16 = vunpack.c.h.s8.bf16 %v62_v15  ;;  %v81_v17 = vunpack.c.l.s8.bf16 %v63_v12  ;;  %v80_v19 = vunpack.c.l.s8.bf16 %v62_v15  ;;  %v60_v21 = vld [vmem:[#allocation6] sm:$0xff]  ;;  %v75_v24 = vld [vmem:[#allocation6 + $0x78] sm:$0xff]  ;;  %v74_v27 = vld [vmem:[#allocation6 + $0x70] sm:$0xff] }
  0x21   :  { %119 = vmatpush1.bf16.msra.mxu0 %v90_v4  ;;  %v79_v20 = vunpack.c.h.s8.bf16 %v61_v18  ;;  %v78_v22 = vunpack.c.h.s8.bf16 %v60_v21  ;;  %v77_v23 = vunpack.c.l.s8.bf16 %v61_v18  ;;  %v76_v25 = vunpack.c.l.s8.bf16 %v60_v21  ;;  %v73_v30 = vld [vmem:[#allocation6 + $0x68] sm:$0xff]  ;;  %v72_v33 = vld [vmem:[#allocation6 + $0x60] sm:$0xff]  ;;  %v71_v36 = vld [vmem:[#allocation6 + $0x58] sm:$0xff] }
  0x22   :  { %120 = vmatprep.subr.bf16.mxu0 %v89_v2  ;;  %v107_v26 = vunpack.c.h.s8.bf16 %v75_v24  ;;  %v106_v28 = vunpack.c.h.s8.bf16 %v74_v27  ;;  %v105_v29 = vunpack.c.l.s8.bf16 %v75_v24  ;;  %v104_v31 = vunpack.c.l.s8.bf16 %v74_v27  ;;  %v70_v39 = vld [vmem:[#allocation6 + $0x50] sm:$0xff]  ;;  %v69_v42 = vld [vmem:[#allocation6 + $0x48] sm:$0xff]  ;;  %v68_v45 = vld [vmem:[#allocation6 + $0x40] sm:$0xff] }
  0x23   :  { %v103_v32 = vunpack.c.h.s8.bf16 %v73_v30  ;;  %v102_v34 = vunpack.c.h.s8.bf16 %v72_v33  ;;  %v101_v35 = vunpack.c.l.s8.bf16 %v73_v30  ;;  %v100_v37 = vunpack.c.l.s8.bf16 %v72_v33  ;;  %v239_v49 = vld [vmem:[#allocation3] ss:$8 sps:$4 sm:$0xff]  }
  0x24   :  { %v99_v38 = vunpack.c.h.s8.bf16 %v71_v36  ;;  %v98_v40 = vunpack.c.h.s8.bf16 %v70_v39  ;;  %v97_v41 = vunpack.c.l.s8.bf16 %v71_v36  ;;  %v96_v43 = vunpack.c.l.s8.bf16 %v70_v39  ;;  %v172_v53 = vld [vmem:[%s363_s2] sm:$0x3]  ;;  %s314_s2 = smov [#allocation8]  }
  0x25   :  { %121 = vmatpush1.bf16.msra.mxu0 %v88_v6  ;;  %v95_v44 = vunpack.c.h.s8.bf16 %v69_v42  ;;  %v94_v46 = vunpack.c.h.s8.bf16 %v68_v45  ;;  %v93_v47 = vunpack.c.l.s8.bf16 %v69_v42  ;;  %v92_v48 = vunpack.c.l.s8.bf16 %v68_v45  ;;  %v173_v55 = vld [vmem:[%s364_s3] sm:$0x3]  ;;  %s217_s5 = sshll.u32 %s314_s2, 4  ;;  %s218_s5 = int_to_ptr.vmem [resolvable:$true] %s217_s5 }
  0x26   :  { %122 = vmatprep.subr.bf16.mxu0 %v87_v7  ;;  %v180_v51 = vshrl.u32 %v179_v50, 7  ;;  %s282_s3 = scalar_lea.vmem %s218_s5, 512  ;;  %p287_p11 = scmp.lt.s32.totalorder %s218_s5, %s218_s5 }
  0x27   :  { %p283_p10 = scmp.ne.s32.totalorder %s218_s5, %s282_s3  ;;  %p288_p12 = scmp.lt.s32.totalorder %s282_s3, %s282_s3 }
  0x28   :  { %v181_v52 = vsub.s32 0, %v180_v51  ;;  %v185_v54 = vsub.s32 1, %v180_v51 }
  0x29   :  { %123 = vmatpush1.bf16.msra.mxu0 %v86_v10  ;;  %p289_p13 = por %p288_p12, %p287_p11 }
  0x2a   :  { %124 = vmatprep.subr.bf16.mxu0 %v85_v11  ;;  %v182_v56 = vrot.slane %v172_v53, %v181_v52  ;;  %v197_v57 = vrot.slane %v173_v55, %v181_v52  ;;  %v186_v58 = vrot.slane %v172_v53, %v185_v54  ;;  %v201_v61 = vrot.slane %v173_v55, %v185_v54 }
  0x2b   :  { %p290_p0 = pnand %p289_p13, %p283_p10 }
  0x2d   :  { %125 = vmatpush1.bf16.msra.mxu0 %v84_v13 }
  0x2e   :  { %126 = vmatprep.subr.bf16.mxu0 %v83_v14 }
  0x31   :  { %127 = vmatpush1.bf16.msra.mxu0 %v82_v16 }
  0x32   :  { %128 = vmatprep.subr.bf16.mxu0 %v81_v17 }
  0x35   :  { %129 = vmatpush1.bf16.msra.mxu0 %v80_v19 }
  0x36   :  { %130 = vmatprep.subr.bf16.mxu0 %v79_v20 }
  0x39   :  { %131 = vmatpush1.bf16.msra.mxu0 %v78_v22 }
  0x3a   :  { %132 = vmatprep.subr.bf16.mxu0 %v77_v23 }
  0x3d   :  { %133 = vmatpush1.bf16.msra.mxu0 %v76_v25 }
  0x3e   :  { %134 = vmatprep.subr.bf16.mxu0 %v107_v26 }
  0x41   :  { %135 = vmatpush2.bf16.msra.mxu0 %v106_v28 }
  0x42   :  { %136 = vmatprep.subr.bf16.mxu0 %v105_v29 }
  0x45   :  { %137 = vmatpush2.bf16.msra.mxu0 %v104_v31 }
  0x46   :  { %138 = vmatprep.subr.bf16.mxu0 %v103_v32 }
  0x49   :  { %139 = vmatpush2.bf16.msra.mxu0 %v102_v34 }
  0x4a   :  { %140 = vmatprep.subr.bf16.mxu0 %v101_v35 }
  0x4d   :  { %141 = vmatpush2.bf16.msra.mxu0 %v100_v37 }
  0x4e   :  { %142 = vmatprep.subr.bf16.mxu0 %v99_v38 }
  0x51   :  { %143 = vmatpush2.bf16.msra.mxu0 %v98_v40 }
  0x52   :  { %144 = vmatprep.subr.bf16.mxu0 %v97_v41 }
  0x55   :  { %145 = vmatpush2.bf16.msra.mxu0 %v96_v43 }
  0x56   :  { %146 = vmatprep.subr.bf16.mxu0 %v95_v44 }
  0x59   :  { %147 = vmatpush2.bf16.msra.mxu0 %v94_v46 }
  0x5a   :  { %148 = vmatprep.subr.bf16.mxu0 %v93_v47 }
  0x5d   :  { %149 = vmatpush2.bf16.msra.mxu0 %v92_v48 }
  0x60   :  { %151 = vmatmul.mubr.bf16.vlgmr.msra.gmra.mxu0 %v239_v49 }
 0x120   :  { %v152_v59 = vpop.f32.mrf.mxu0 }
 0x121   :  { %v189_v60 = vmul.f32 %v182_v56, %v152_v59 }
 0x122   :  { %v154_v62 = vpop.f32.mrf.mxu0 }
 0x123   :  { %v204_v63 = vadd.f32 %v197_v57, %v189_v60  ;;  %v190_v0 = vmul.f32 %v186_v58, %v154_v62 }
 0x124   :  { %v156_v1 = vpop.f32.mrf.mxu0 }
 0x125   :  { %208 = vst [vmem:[#allocation8] sm:$0xff] %v204_v63  ;;  %v205_v2 = vadd.f32 %v201_v61, %v190_v0  ;;  %v191_v3 = vmul.f32 %v182_v56, %v156_v1 }
 0x126   :  { %v158_v4 = vpop.f32.mrf.mxu0 }
 0x127   :  { %209 = vst [vmem:[#allocation8 + $0x8] sm:$0xff] %v205_v2  ;;  %v206_v5 = vadd.f32 %v197_v57, %v191_v3  ;;  %v192_v6 = vmul.f32 %v186_v58, %v158_v4 }
 0x129   :  { %210 = vst [vmem:[#allocation8 + $0x10] sm:$0xff] %v206_v5  ;;  %v207_v7 = vadd.f32 %v201_v61, %v192_v6 }
 0x12b   :  { %211 = vst [vmem:[#allocation8 + $0x18] sm:$0xff] %v207_v7 }
 0x12c   :  { %293 = shalt.err (!%p290_p0)
}
 0x12d   :  { %223 = dma.vmem_to_hbm [thread:$0]  %s218_s5, 512, %s365_s4, [#allocation5], %s312_s25, %s312_s25, %s313_s26  }
 0x12e   :  { %306 = dma.done.wait [#allocation5], 512  }
 0x12f   :  { %307 = vsyncadd [#allocation5], 4294966784 }
 0x130   :  { %227 = vsyncpa [#allocation4], 1 }
 0x131   :  { %228 = vsyncpa [#allocation7], 1 }
 0x132   :  { %229 = vsyncpa [#allocation5], 1 }

</bundles_post_ra>
